<compile_context>
chip_gen: v6e
topology: v6e:2x2x1
jax: 0.10.0
libtpu: 0.0.40
codegen_flags: <defaults>
</compile_context>

<pallas_src>
import functools

import jax
import jax.numpy as jnp
from jax.experimental import pallas as pl
from jax.experimental.pallas import tpu as pltpu

LANE = 128
SUBLANE = 8


def _round_up(n, m):
    return ((n + m - 1) // m) * m


def mlp_kernel(x_ref, w1_ref, b1_ref, w2_ref, b2_ref, o_ref, *, d_out):
    # fc1: [TB, D_in](bf16) @ [D_in, HP](bf16) -> f32 accumulation on the MXU.
    h = jnp.dot(x_ref[...], w1_ref[...], preferred_element_type=jnp.float32)
    h = jnp.maximum(h + b1_ref[...], 0.0)                      # bias + ReLU in f32
    # fc2: [TB, HP] @ [HP, OP]
    logits = jnp.dot(h.astype(jnp.bfloat16), w2_ref[...],
                     preferred_element_type=jnp.float32)
    logits = logits + b2_ref[...]

    op = logits.shape[1]
    if op != d_out:
        # Output width is lane-padded: mask padded logits out of the softmax.
        col = jax.lax.broadcasted_iota(jnp.int32, logits.shape, 1)
        logits = jnp.where(col < d_out, logits, -jnp.inf)

    # Numerically stable row-wise softmax (padded lanes: exp(-inf) == 0).
    m = jnp.max(logits, axis=1, keepdims=True)
    e = jnp.exp(logits - m)
    denom = jnp.sum(e, axis=1, keepdims=True)
    o_ref[...] = (e * pl.reciprocal(denom, approx=False)).astype(o_ref.dtype)


def prepare_mlp_params(w1, b1, w2, b2):
    """Pad feature dims to 128 lanes and cast weights to bf16, ONCE per param set.

    w1:[D_in,H], b1:[H], w2:[H,D_out], b2:[D_out]  ->
      (w1p:[D_in,HP] bf16, b1p:[1,HP] f32, w2p:[HP,OP] bf16, b2p:[1,OP] f32), D_out
    Padding is mathematically inert: padded hidden units have 0 weight / 0 bias,
    padded logits are masked in-kernel.
    """
    D_in, H = w1.shape
    D_out = w2.shape[1]
    HP = _round_up(H, LANE)
    OP = _round_up(D_out, LANE)

    w1p = jnp.zeros((D_in, HP), jnp.float32).at[:, :H].set(w1).astype(jnp.bfloat16)
    b1p = jnp.zeros((1, HP), jnp.float32).at[:, :H].set(b1.reshape(1, H))
    w2p = jnp.zeros((HP, OP), jnp.float32).at[:H, :D_out].set(w2).astype(jnp.bfloat16)
    b2p = jnp.zeros((1, OP), jnp.float32).at[:, :D_out].set(b2.reshape(1, D_out))
    return (w1p, b1p, w2p, b2p), D_out


def _vmem_limit_bytes(TB, D_in, HP, OP):
    # Resident weights/biases are double-buffered by the default pipeliner;
    # x (bf16) and out (f32) are double-buffered per grid step. 1.5x headroom,
    # clamped to [32 MiB, 64 MiB] so it is valid on v5e/v6e/v7x alike.
    weight_bytes = D_in * HP * 2 + HP * OP * 2 + (HP + OP) * 4
    stream_bytes = 2 * TB * D_in * 2 + 2 * TB * OP * 4
    est = 2 * weight_bytes + stream_bytes
    return int(min(64 << 20, max(32 << 20, (est * 3) // 2)))


@functools.partial(jax.jit, static_argnames=("d_out", "block_b"))
def mlp_forward_padded(x, w1p, b1p, w2p, b2p, *, d_out, block_b=256):
    """x:[B,D_in] (f32 or bf16), pre-padded params -> softmax probs [B, d_out] f32."""
    B, D_in = x.shape
    HP = w1p.shape[1]
    OP = w2p.shape[1]

    # Stream x through HBM as bf16 (producers should ideally hand us bf16 directly).
    if x.dtype != jnp.bfloat16:
        x = x.astype(jnp.bfloat16)

    TB = min(block_b, _round_up(B, SUBLANE))   # batch tile, multiple of 8 sublanes
    grid = (pl.cdiv(B, TB),)                   # ragged last block, no x padding copy
    vmem = pltpu.MemorySpace.VMEM

    out = pl.pallas_call(
        functools.partial(mlp_kernel, d_out=d_out),
        out_shape=jax.ShapeDtypeStruct((B, OP), jnp.float32),
        grid=grid,
        in_specs=[
            # x advances with the batch grid index
            pl.BlockSpec((TB, D_in), lambda i: (i, 0), memory_space=vmem),
            # weights / biases: constant block index -> fetched once, VMEM-resident
            pl.BlockSpec((D_in, HP), lambda i: (0, 0), memory_space=vmem),
            pl.BlockSpec((1, HP), lambda i: (0, 0), memory_space=vmem),
            pl.BlockSpec((HP, OP), lambda i: (0, 0), memory_space=vmem),
            pl.BlockSpec((1, OP), lambda i: (0, 0), memory_space=vmem),
        ],
        out_specs=pl.BlockSpec((TB, OP), lambda i: (i, 0), memory_space=vmem),
        compiler_params=pltpu.CompilerParams(
            dimension_semantics=("parallel",),
            vmem_limit_bytes=_vmem_limit_bytes(TB, D_in, HP, OP),
        ),
    )(x, w1p, b1p, w2p, b2p)

    # Drop the padded output lanes to match the nn.Module output shape.
    return out[:, :d_out]


def mlp_forward(x, w1, b1, w2, b2, *, block_b=256):
    """Convenience wrapper. In real use, call prepare_mlp_params() once and reuse."""
    params, d_out = prepare_mlp_params(w1, b1, w2, b2)
    return mlp_forward_padded(x, *params, d_out=d_out, block_b=block_b)


# ----------------------------- references / tests -----------------------------

def reference_mlp_f32(x, w1, b1, w2, b2):
    h = jnp.maximum(x @ w1 + b1, 0.0)
    return jax.nn.softmax(h @ w2 + b2, axis=1)


def reference_mlp_bf16(x, w1, b1, w2, b2):
    # Mirrors the kernel's numerics (bf16 MXU inputs, f32 accumulation).
    xb = x.astype(jnp.bfloat16)
    h = jnp.dot(xb, w1.astype(jnp.bfloat16),
                preferred_element_type=jnp.float32) + b1
    h = jnp.maximum(h, 0.0)
    logits = jnp.dot(h.astype(jnp.bfloat16), w2.astype(jnp.bfloat16),
                     preferred_element_type=jnp.float32) + b2
    return jax.nn.softmax(logits, axis=1)


def _make_params(key, d_in, hidden, d_out):
    k1, kb1, k2, kb2 = jax.random.split(key, 4)
    lim1 = 1.0 / (d_in ** 0.5)
    w1 = jax.random.uniform(k1, (d_in, hidden), jnp.float32, -lim1, lim1)
    b1 = jax.random.uniform(kb1, (hidden,), jnp.float32, -lim1, lim1)
    lim2 = 1.0 / (hidden ** 0.5)
    w2 = jax.random.uniform(k2, (hidden, d_out), jnp.float32, -lim2, lim2)
    b2 = jax.random.uniform(kb2, (hidden,), jnp.float32, -lim2, lim2)[:d_out] \
        if False else jax.random.uniform(kb2, (d_out,), jnp.float32, -lim2, lim2)
    return w1, b1, w2, b2


def _run_and_check(batch, d_in, hidden, d_out, key, block_b):
    kx, kp = jax.random.split(key)
    x = jax.random.normal(kx, (batch, d_in), dtype=jnp.float32)
    w1, b1, w2, b2 = _make_params(kp, d_in, hidden, d_out)

    # Hoist padding/casting out of the per-call path, then run the fused kernel.
    params, _d_out = prepare_mlp_params(w1, b1, w2, b2)
    out = mlp_forward_padded(x, *params, d_out=_d_out, block_b=block_b)
    out = jax.block_until_ready(out)

    assert out.shape == (batch, d_out)
    # primary check: matches a reference with identical (bf16-matmul) numerics
    ref_bf16 = reference_mlp_bf16(x, w1, b1, w2, b2)
    assert jnp.allclose(out, ref_bf16, atol=2e-3), "mismatch vs bf16 reference"
    # sanity check: close to the full-f32 PyTorch-equivalent forward
    ref_f32 = reference_mlp_f32(x, w1, b1, w2, b2)
    assert jnp.allclose(out, ref_f32, atol=5e-2), "mismatch vs f32 reference"
    # rows of the softmax sum to ~1 (exact reciprocal -> tight tolerance)
    assert jnp.allclose(jnp.sum(out, axis=1), jnp.ones((batch,)), atol=1e-4)
    return out


if __name__ == "__main__":
    key = jax.random.PRNGKey(0)
    k_small, k_big = jax.random.split(key)

    # Shapes implied by the module: x: [batch, input_size]
    _run_and_check(batch=8, d_in=16, hidden=32, d_out=8, key=k_small, block_b=256)

    # Multi-step grid with a ragged final batch block (200 rows, 128-row tiles).
    _run_and_check(batch=200, d_in=64, hidden=256, d_out=10, key=k_big, block_b=128)

    print("KERNEL_OK")
</pallas_src>

<mosaic_0001>
module attributes {stable_mosaic.version = 11 : i64} {
  func.func @mlp_kernel(%arg0: i32, %arg1: memref<8x16xbf16, #tpu.memory_space<vmem>>, %arg2: memref<16x128xbf16, #tpu.memory_space<vmem>>, %arg3: memref<1x128xf32, #tpu.memory_space<vmem>>, %arg4: memref<128x128xbf16, #tpu.memory_space<vmem>>, %arg5: memref<1x128xf32, #tpu.memory_space<vmem>>, %arg6: memref<8x128xf32, #tpu.memory_space<vmem>>) attributes {dimension_semantics = [#tpu.dimension_semantics<parallel>], iteration_bounds = array<i64: 1>, scalar_prefetch = 0 : i64, scratch_operands = 0 : i64, tpu.core_type = #tpu.core_type<tc>, window_params = [{transform_indices = @transform_0, window_bounds = array<i64: 8, 16>}, {pipeline_mode = #tpu.pipeline_mode<synchronous>, transform_indices = @transform_1, window_bounds = array<i64: 16, 128>}, {pipeline_mode = #tpu.pipeline_mode<synchronous>, transform_indices = @transform_2, window_bounds = array<i64: 1, 128>}, {pipeline_mode = #tpu.pipeline_mode<synchronous>, transform_indices = @transform_3, window_bounds = array<i64: 128, 128>}, {pipeline_mode = #tpu.pipeline_mode<synchronous>, transform_indices = @transform_4, window_bounds = array<i64: 1, 128>}, {transform_indices = @transform_5, window_bounds = array<i64: 8, 128>}]} {
    %c0 = arith.constant 0 : index
    %c0_0 = arith.constant 0 : index
    %0 = vector.load %arg1[%c0, %c0_0] : memref<8x16xbf16, #tpu.memory_space<vmem>>, vector<8x16xbf16>
    %c0_1 = arith.constant 0 : index
    %c0_2 = arith.constant 0 : index
    %1 = vector.load %arg2[%c0_1, %c0_2] : memref<16x128xbf16, #tpu.memory_space<vmem>>, vector<16x128xbf16>
    %cst = arith.constant dense<0.000000e+00> : vector<8x128xf32>
    %2 = tpu.matmul %0, %1, %cst {dimension_numbers = #tpu.dot_dimension_numbers<[1], [0], [0], [1], [0, 0, 1, 1], [], []>} : vector<8x16xbf16>, vector<16x128xbf16>, vector<8x128xf32> -> vector<8x128xf32>
    %c0_3 = arith.constant 0 : index
    %c0_4 = arith.constant 0 : index
    %3 = vector.load %arg3[%c0_3, %c0_4] : memref<1x128xf32, #tpu.memory_space<vmem>>, vector<1x128xf32>
    %4 = vector.broadcast %3 : vector<1x128xf32> to vector<8x128xf32>
    %5 = arith.addf %2, %4 : vector<8x128xf32>
    %cst_5 = arith.constant 0.000000e+00 : f32
    %6 = vector.broadcast %cst_5 : f32 to vector<8x128xf32>
    %7 = arith.maximumf %5, %6 : vector<8x128xf32>
    %8 = arith.truncf %7 : vector<8x128xf32> to vector<8x128xbf16>
    %c0_6 = arith.constant 0 : index
    %c0_7 = arith.constant 0 : index
    %9 = vector.load %arg4[%c0_6, %c0_7] : memref<128x128xbf16, #tpu.memory_space<vmem>>, vector<128x128xbf16>
    %cst_8 = arith.constant dense<0.000000e+00> : vector<8x128xf32>
    %10 = tpu.matmul %8, %9, %cst_8 {dimension_numbers = #tpu.dot_dimension_numbers<[1], [0], [0], [1], [0, 0, 1, 1], [], []>} : vector<8x128xbf16>, vector<128x128xbf16>, vector<8x128xf32> -> vector<8x128xf32>
    %c0_9 = arith.constant 0 : index
    %c0_10 = arith.constant 0 : index
    %11 = vector.load %arg5[%c0_9, %c0_10] : memref<1x128xf32, #tpu.memory_space<vmem>>, vector<1x128xf32>
    %12 = vector.broadcast %11 : vector<1x128xf32> to vector<8x128xf32>
    %13 = arith.addf %10, %12 : vector<8x128xf32>
    %14 = tpu.iota {dimensions = array<i32: 1>} : vector<8x128xi32>
    %c8_i32 = arith.constant 8 : i32
    %15 = vector.broadcast %c8_i32 : i32 to vector<8x128xi32>
    %16 = arith.cmpi slt, %14, %15 : vector<8x128xi32>
    %cst_11 = arith.constant 0xFF800000 : f32
    %17 = vector.broadcast %cst_11 : f32 to vector<8x128xf32>
    %18 = arith.select %16, %13, %17 : vector<8x128xi1>, vector<8x128xf32>
    %cst_12 = arith.constant dense<0xFF800000> : vector<8xf32>
    %19 = vector.multi_reduction <maximumf>, %18, %cst_12 [1] : vector<8x128xf32> to vector<8xf32>
    %20 = vector.shape_cast %19 : vector<8xf32> to vector<8x1xf32>
    %21 = vector.broadcast %20 : vector<8x1xf32> to vector<8x128xf32>
    %22 = arith.subf %18, %21 : vector<8x128xf32>
    %23 = math.exp %22 : vector<8x128xf32>
    %cst_13 = arith.constant dense<0.000000e+00> : vector<8xf32>
    %24 = vector.multi_reduction <add>, %23, %cst_13 [1] : vector<8x128xf32> to vector<8xf32>
    %25 = vector.shape_cast %24 : vector<8xf32> to vector<8x1xf32>
    %26 = tpu.reciprocal %25 : vector<8x1xf32> -> vector<8x1xf32>
    %27 = vector.broadcast %26 : vector<8x1xf32> to vector<8x128xf32>
    %28 = arith.mulf %23, %27 : vector<8x128xf32>
    %c0_14 = arith.constant 0 : index
    %c0_15 = arith.constant 0 : index
    %29 = vector.load %arg6[%c0_14, %c0_15] : memref<8x128xf32, #tpu.memory_space<vmem>>, vector<8x128xf32>
    tpu.vector_store %arg6[%c0_14, %c0_15], %28 {strides = array<i32>} : memref<8x128xf32, #tpu.memory_space<vmem>>, vector<8x128xf32>,
    return
  }
  func.func @transform_0(%arg0: i32) -> (i32, i32) {
    %c0_i32 = arith.constant 0 : i32
    %c0_i32_0 = arith.constant 0 : i32
    return %arg0, %c0_i32 : i32, i32
  }
  func.func @transform_1(%arg0: i32) -> (i32, i32) {
    %c0_i32 = arith.constant 0 : i32
    %c0_i32_0 = arith.constant 0 : i32
    %c0_i32_1 = arith.constant 0 : i32
    return %c0_i32, %c0_i32_0 : i32, i32
  }
  func.func @transform_2(%arg0: i32) -> (i32, i32) {
    %c0_i32 = arith.constant 0 : i32
    %c0_i32_0 = arith.constant 0 : i32
    %c0_i32_1 = arith.constant 0 : i32
    return %c0_i32, %c0_i32_0 : i32, i32
  }
  func.func @transform_3(%arg0: i32) -> (i32, i32) {
    %c0_i32 = arith.constant 0 : i32
    %c0_i32_0 = arith.constant 0 : i32
    %c0_i32_1 = arith.constant 0 : i32
    return %c0_i32, %c0_i32_0 : i32, i32
  }
  func.func @transform_4(%arg0: i32) -> (i32, i32) {
    %c0_i32 = arith.constant 0 : i32
    %c0_i32_0 = arith.constant 0 : i32
    %c0_i32_1 = arith.constant 0 : i32
    return %c0_i32, %c0_i32_0 : i32, i32
  }
  func.func @transform_5(%arg0: i32) -> (i32, i32) {
    %c0_i32 = arith.constant 0 : i32
    %c0_i32_0 = arith.constant 0 : i32
    return %arg0, %c0_i32 : i32, i32
  }
}

</mosaic_0001>

<bundles_post_ra>
// kernel: mlp_forward_padded.1
= control target key start
LH: loop header
LB: loop body
LE: loop exit
PB: predicated region body
PF: predicated region fallthrough
CT: control target
= control target key end

     0   :  { %10 = vsyncpa [#allocation3], 0  ;;  %s404_s0 = inlined_call_operand.vmem [shape: bf16[8,16], index: 0, kind: input, shape index: {}]   ;;  %s405_s1 = inlined_call_operand.vmem [shape: bf16[16,128], index: 1, kind: input, shape index: {}]   ;;  %s406_s2 = inlined_call_operand.vmem [shape: f32[1,128], index: 2, kind: input, shape index: {}]   ;;  %s407_s3 = inlined_call_operand.hbm [shape: bf16[128,128], index: 3, kind: input, shape index: {}]   ;;  %s408_s4 = inlined_call_operand.vmem [shape: f32[1,128], index: 4, kind: input, shape index: {}]   ;;  %s409_s5 = inlined_call_operand.hbm [shape: f32[8,128], index: 5, kind: output, shape index: {}]  }
   0x1   :  { %11 = vsyncpa [#allocation4], 0  ;;  %s350_s18 = smov [#allocation2]  }
   0x2   :  { %s23_s19 = sshll.u32 %s350_s18, 4  ;;  %s24_s19 = int_to_ptr.vmem [resolvable:$true] %s23_s19 }
   0x3   :  { %s314_s20 = scalar_lea.vmem %s24_s19, 1024  ;;  %p319_p1 = scmp.lt.s32.totalorder %s24_s19, %s24_s19 }
   0x4   :  { %p315_p0 = scmp.ne.s32.totalorder %s24_s19, %s314_s20  ;;  %p320_p2 = scmp.lt.s32.totalorder %s314_s20, %s314_s20 }
   0x6   :  { %p321_p3 = por %p320_p2, %p319_p1 }
   0x8   :  { %p322_p4 = pnand %p321_p3, %p315_p0 }
   0xa   :  { %325 = shalt.err (!%p322_p4)
}
   0xb   :  { %s351_s21 = smov 64   ;;  %s352_s22 = smov 4  }
   0xc   :  { %29 = dma.hbm_to_vmem [thread:$0]  %s407_s3, 1024, %s24_s19, [#allocation3], %s351_s21, %s351_s21, %s352_s22  }
   0xd   :  { %346 = dma.done.wait [#allocation3], 1024  }
   0xe   :  { %347 = vsyncadd [#allocation3], 4294966272  ;;  %v353_v0 = vmov 0.0   ;;  %vm354_vm0 = vmmov 0   ;;  %v293_v1 = vld [vmem:[%s405_s1] sm:$0xff]   ;;  %vm52_vm1 = vcmask 130048   ;;  %v209_v19 = vlaneseq }
   0xf   :  { %261 = vmatprep.subr.bf16.mxu0 %v353_v0  ;;  %263 = vmatprep.mubr.msk.bf16.mxu0 %vm354_vm0, %v353_v0  ;;  %v36_v2 = vld [vmem:[%s404_s0] sm:$0xf]  ;;  %v294_v3 = vld [vmem:[#allocation2 + $0x38] sm:$0xff]   ;;  %v295_v4 = vld [vmem:[#allocation2 + $0x30] sm:$0xff]  }
  0x10   :  { %267 = vmatprep.subr.bf16.mxu1 %v353_v0  ;;  %283 = vmatprep.mubr.msk.bf16.mxu1 %vm354_vm0, %v353_v0  ;;  %v296_v5 = vld [vmem:[#allocation2 + $0x28] sm:$0xff]   ;;  %v297_v6 = vld [vmem:[#allocation2 + $0x20] sm:$0xff]   ;;  %v298_v7 = vld [vmem:[#allocation2 + $0x18] sm:$0xff]   ;;  %v210_v20 = vand.u32 127, %v209_v19 }
  0x11   :  { %262 = vmatpush3.bf16.msra.mxu0 %v293_v1  ;;  %268 = vmatpush3.bf16.msra.mxu1 %v294_v3  ;;  %v299_v8 = vld [vmem:[#allocation2 + $0x10] sm:$0xff]   ;;  %v300_v9 = vld [vmem:[#allocation2 + $0x8] sm:$0xff]   ;;  %v301_v10 = vld [vmem:[#allocation2] sm:$0xff]  }
  0x12   :  { %269 = vmatprep.subr.bf16.mxu1 %v353_v0  ;;  %v238_v11 = vld [vmem:[%s406_s2] ss:$0 sm:$0xff]  ;;  %vm211_vm2 = vcmp.lt.s32.totalorder %v210_v20, 8  ;;  %s355_s2 = smov [#allocation5]  }
  0x13   :  { %v241_v21 = vld [vmem:[%s408_s4] ss:$0 sm:$0xff]  ;;  %s229_s30 = sshll.u32 %s355_s2, 4  ;;  %s230_s30 = int_to_ptr.vmem [resolvable:$true] %s229_s30 }
  0x14   :  { %264 = vmatmul.mubr.msk.bf16.vlgmr.msra.gmra.mxu0 %vm52_vm1, %v36_v2  ;;  %s326_s4 = scalar_lea.vmem %s230_s30, 128  ;;  %p331_p6 = scmp.lt.s32.totalorder %s230_s30, %s230_s30 }
  0x15   :  { %270 = vmatpush3.bf16.msra.mxu1 %v295_v4  ;;  %p327_p5 = scmp.ne.s32.totalorder %s230_s30, %s326_s4  ;;  %p332_p7 = scmp.lt.s32.totalorder %s326_s4, %s326_s4 }
  0x16   :  { %271 = vmatprep.subr.bf16.mxu1 %v353_v0 }
  0x17   :  { %p333_p8 = por %p332_p7, %p331_p6 }
  0x19   :  { %272 = vmatpush3.bf16.msra.mxu1 %v296_v5  ;;  %p334_p9 = pnand %p333_p8, %p327_p5 }
  0x1a   :  { %273 = vmatprep.subr.bf16.mxu1 %v353_v0 }
  0x1d   :  { %274 = vmatpush3.bf16.msra.mxu1 %v297_v6 }
  0x1e   :  { %275 = vmatprep.subr.bf16.mxu1 %v353_v0 }
  0x21   :  { %276 = vmatpush3.bf16.msra.mxu1 %v298_v7 }
  0x22   :  { %277 = vmatprep.subr.bf16.mxu1 %v353_v0 }
  0x25   :  { %278 = vmatpush3.bf16.msra.mxu1 %v299_v8 }
  0x26   :  { %279 = vmatprep.subr.bf16.mxu1 %v353_v0 }
  0x29   :  { %280 = vmatpush3.bf16.msra.mxu1 %v300_v9 }
  0x2a   :  { %281 = vmatprep.subr.bf16.mxu1 %v353_v0 }
  0x2d   :  { %282 = vmatpush3.bf16.msra.mxu1 %v301_v10 }
  0xd4   :  { %v90_v12 = vpop.f32.mrf.mxu0 }
  0xd5   :  { %v91_v13 = vadd.f32 %v238_v11, %v90_v12 }
  0xd6   :  { %v265_v14 = vpop.f32.mrf.mxu0 }
  0xd7   :  { %v96_v15 = vmax.f32 %v91_v13, 0.0 }
  0xd8   :  { %v93_v16 = vpop.f32.mrf.mxu0 }
  0xd9   :  { %v97_v17 = vpack.c.bf16 %v96_v15, %v96_v15 }
  0xda   :  { %v266_v18 = vpop.f32.mrf.mxu0 }
  0xdb   :  { %284 = vmatmul.mubr.bf16.vlgmr.msra.gmra.mxu1 %v97_v17 }
 0x19b   :  { %v203_v22 = vpop.f32.mrf.mxu1 }
 0x19c   :  { %v204_v23 = vadd.f32 %v241_v21, %v203_v22 }
 0x19d   :  { %v285_v24 = vpop.f32.mrf.mxu1 }
 0x19e   :  { %v212_v25 = vsel %vm211_vm2, %v204_v23, -inf }
 0x19f   :  { %213 = vmax.xlane.f32.xlu0 %v212_v25  ;;  %v206_v26 = vpop.f32.mrf.mxu1 }
 0x1a1   :  { %v286_v27 = vpop.f32.mrf.mxu1 }
 0x228   :  { %v214_v28 = vpop.xlane.xlu0 %213 }
 0x229   :  { %v215_v29 = vsub.f32 %v212_v25, %v214_v28 }
 0x22b   :  { %v216_v30 = vmul.f32 1.442695, %v215_v29 }
 0x22d   :  { %302 = vpow2.f32 %v216_v30 }
 0x23a   :  { %v303_v31 = vpop.eup %302 }
 0x23b   :  { %218 = vadd.xlane.f32.xlu0 %v303_v31 }
 0x2c4   :  { %v219_v32 = vpop.xlane.xlu0 %218 }
 0x2c5   :  { %304 = vrcp.f32 %v219_v32 }
 0x2d2   :  { %v305_v33 = vpop.eup %304 }
 0x2d3   :  { %v221_v34 = vmul.f32 %v305_v33, %v303_v31 }
 0x2d5   :  { %222 = vst [vmem:[#allocation5] sm:$0xff] %v221_v34 }
 0x2d6   :  { %337 = shalt.err (!%p334_p9)
}
 0x2d7   :  { %232 = dma.vmem_to_hbm [thread:$0]  %s230_s30, 128, %s409_s5, [#allocation4]  }
 0x2d8   :  { %348 = dma.done.wait [#allocation4], 128  }
 0x2d9   :  { %349 = vsyncadd [#allocation4], 4294967168 }
 0x2da   :  { %236 = vsyncpa [#allocation3], 1 }
 0x2db   :  { %237 = vsyncpa [#allocation4], 1 }

</bundles_post_ra>
